<compile_context>
chip_gen: v5e
topology: v5e:2x2
jax: 0.10.0
libtpu: 0.0.40
codegen_flags: <defaults>
</compile_context>

<pallas_src>
import functools

import jax
import jax.numpy as jnp
from jax.experimental import pallas as pl
from jax.experimental.pallas import tpu as pltpu


# ----------------------------- helpers --------------------------------------


def _round_up(x: int, m: int) -> int:
    return ((x + m - 1) // m) * m


def _pad_to(a: jax.Array, axis: int, target: int) -> jax.Array:
    pad = target - a.shape[axis]
    if pad <= 0:
        return a
    widths = [(0, 0)] * a.ndim
    widths[axis] = (0, pad)
    return jnp.pad(a, widths)


def _vmem_capacity_bytes() -> int:
    """Physical VMEM per TensorCore; conservative (v7x-sized) fallback."""
    try:
        cap = int(getattr(pltpu.get_tpu_info(), "vmem_capacity_bytes", 0))
        if cap > 0:
            return cap
    except Exception:
        pass
    return 64 * 1024 * 1024


# ----------------------------- kernels --------------------------------------
# Invariant for both kernels (do NOT change): the reduction axis k is the LAST
# (innermost, "arbitrary") grid axis and the output index_maps do not depend on
# k, so the output block stays resident in VMEM across k and is only flushed to
# HBM after the final k step.  Accumulating into the f32 output block and writing
# the other outputs only on the last k step relies on this.


def _encode_kernel(x_ref, w_ref, lb_ref, *refs, n_out, direct_acc):
    """acc += x @ W_enc.T ; epilogue: +latent_bias_eff, ReLU, multi-dtype stores."""
    pre_ref = refs[0]
    lat_ref = refs[1]
    latc_ref = refs[2] if n_out == 3 else None
    acc_ref = pre_ref if direct_acc else refs[n_out]

    k = pl.program_id(2)

    @pl.when(k == 0)
    def _init():
        acc_ref[...] = jnp.zeros_like(acc_ref)

    acc_ref[...] += jnp.dot(x_ref[...], w_ref[...],
                            preferred_element_type=jnp.float32)

    @pl.when(k == pl.num_programs(2) - 1)
    def _finalize():
        v = acc_ref[...] + lb_ref[...]          # (tm,tn) + (1,tn), f32
        relu = jnp.maximum(v, 0.0)
        pre_ref[...] = v.astype(pre_ref.dtype)
        lat_ref[...] = relu.astype(lat_ref.dtype)
        if latc_ref is not None:                # decode-facing compute-dtype copy
            latc_ref[...] = relu.astype(latc_ref.dtype)


def _decode_kernel(l_ref, w_ref, pb_ref, rec_ref, *scratch, direct_acc):
    """acc += latents @ W_dec ; epilogue: + pre_bias."""
    acc_ref = rec_ref if direct_acc else scratch[0]
    k = pl.program_id(2)

    @pl.when(k == 0)
    def _init():
        acc_ref[...] = jnp.zeros_like(acc_ref)

    acc_ref[...] += jnp.dot(l_ref[...], w_ref[...],
                            preferred_element_type=jnp.float32)

    @pl.when(k == pl.num_programs(2) - 1)
    def _finalize():
        rec_ref[...] = (acc_ref[...] + pb_ref[...]).astype(rec_ref.dtype)


# ----------------------------- launchers ------------------------------------


def _encode_call(x_p, w_enc_t_p, lb_p, tm, tk, tn, out_dtype, cdtype,
                 emit_latc, vmem_limit):
    Mp, Kp = x_p.shape
    _, Np = w_enc_t_p.shape
    grid = (Mp // tm, Np // tn, Kp // tk)
    direct_acc = jnp.dtype(out_dtype) == jnp.dtype(jnp.float32)
    n_out = 3 if emit_latc else 2

    out_shape = [jax.ShapeDtypeStruct((Mp, Np), out_dtype),
                 jax.ShapeDtypeStruct((Mp, Np), out_dtype)]
    out_specs = [pl.BlockSpec((tm, tn), lambda i, j, k: (i, j)),
                 pl.BlockSpec((tm, tn), lambda i, j, k: (i, j))]
    if emit_latc:
        out_shape.append(jax.ShapeDtypeStruct((Mp, Np), cdtype))
        out_specs.append(pl.BlockSpec((tm, tn), lambda i, j, k: (i, j)))
    scratch = [] if direct_acc else [pltpu.VMEM((tm, tn), jnp.float32)]

    cb = jnp.dtype(cdtype).itemsize
    ob = jnp.dtype(out_dtype).itemsize
    bytes_accessed = int(grid[1] * Mp * Kp * cb            # x re-read per N tile
                         + grid[0] * Kp * Np * cb          # W re-read per M tile
                         + Mp * Np * (2 * ob + (cb if emit_latc else 0)))
    cost = pl.CostEstimate(flops=2 * Mp * Kp * Np, transcendentals=0,
                           bytes_accessed=bytes_accessed)

    return pl.pallas_call(
        functools.partial(_encode_kernel, n_out=n_out, direct_acc=direct_acc),
        out_shape=tuple(out_shape),
        grid_spec=pltpu.PrefetchScalarGridSpec(
            num_scalar_prefetch=0,
            grid=grid,
            in_specs=[
                pl.BlockSpec((tm, tk), lambda i, j, k: (i, k)),    # x
                pl.BlockSpec((tk, tn), lambda i, j, k: (k, j)),    # W_enc.T
                pl.BlockSpec((1, tn), lambda i, j, k: (0, j)),     # latent_bias_eff
            ],
            out_specs=tuple(out_specs),
            scratch_shapes=scratch),
        compiler_params=pltpu.CompilerParams(
            dimension_semantics=("parallel", "parallel", "arbitrary"),
            vmem_limit_bytes=vmem_limit),
        cost_estimate=cost,
    )(x_p, w_enc_t_p, lb_p)


def _decode_call(lat_p, w_dec_p, pb_p, tm, tk, tn, out_dtype, vmem_limit):
    Mp, Kp = lat_p.shape
    _, Np = w_dec_p.shape
    grid = (Mp // tm, Np // tn, Kp // tk)
    direct_acc = jnp.dtype(out_dtype) == jnp.dtype(jnp.float32)
    scratch = [] if direct_acc else [pltpu.VMEM((tm, tn), jnp.float32)]

    cb = lat_p.dtype.itemsize
    ob = jnp.dtype(out_dtype).itemsize
    bytes_accessed = int(grid[1] * Mp * Kp * cb             # latents re-read per N tile
                         + grid[0] * Kp * Np * w_dec_p.dtype.itemsize
                         + Mp * Np * ob)
    cost = pl.CostEstimate(flops=2 * Mp * Kp * Np, transcendentals=0,
                           bytes_accessed=bytes_accessed)

    return pl.pallas_call(
        functools.partial(_decode_kernel, direct_acc=direct_acc),
        out_shape=jax.ShapeDtypeStruct((Mp, Np), out_dtype),
        grid_spec=pltpu.PrefetchScalarGridSpec(
            num_scalar_prefetch=0,
            grid=grid,
            in_specs=[
                pl.BlockSpec((tm, tk), lambda i, j, k: (i, k)),    # latents
                pl.BlockSpec((tk, tn), lambda i, j, k: (k, j)),    # W_dec
                pl.BlockSpec((1, tn), lambda i, j, k: (0, j)),     # pre_bias
            ],
            out_specs=pl.BlockSpec((tm, tn), lambda i, j, k: (i, j)),
            scratch_shapes=scratch),
        compiler_params=pltpu.CompilerParams(
            dimension_semantics=("parallel", "parallel", "arbitrary"),
            vmem_limit_bytes=vmem_limit),
        cost_estimate=cost,
    )(lat_p, w_dec_p, pb_p)


# ----------------------------- public API -----------------------------------


def prepare_autoencoder_params(enc_weight, pre_bias, latent_bias, dec_weight=None,
                               *, compute_dtype=jnp.bfloat16,
                               l_tile=1024, d_enc_tile=2048, d_dec_tile=2048):
    """One-time layout work (transpose / cast / pad / bias fold), off the hot path.

    enc_weight:  (n_latents, n_inputs)  == PyTorch encoder.weight
    pre_bias:    (n_inputs,)
    latent_bias: (n_latents,)
    dec_weight:  (n_inputs, n_latents)  == PyTorch decoder.weight; None => tied.
    """
    n_latents, n_inputs = enc_weight.shape
    cdtype = jnp.dtype(compute_dtype)

    # Fold the (x - pre_bias) subtraction out of the encode inner loop:
    #   (x - b) @ W.T + lb  ==  x @ W.T + (lb - b @ W.T)
    lat_bias_eff = latent_bias.astype(jnp.float32) - jnp.matmul(
        pre_bias.astype(jnp.float32), enc_weight.astype(jnp.float32).T,
        precision=jax.lax.Precision.HIGHEST)

    # Tile sizes on the weight dims (encode/decode are decoupled; only the L axis
    # is shared between encode-N and decode-K, so it uses a single tile size tl).
    tl = int(min(l_tile, _round_up(n_latents, 128)))
    tk_e = int(min(d_enc_tile, _round_up(n_inputs, 128)))
    tn_d = int(min(d_dec_tile, _round_up(n_inputs, 128)))
    Lp = _round_up(n_latents, tl)
    Dp_e = _round_up(n_inputs, tk_e)
    Dp_d = _round_up(n_inputs, tn_d)

    w_enc_t = _pad_to(_pad_to(enc_weight.T.astype(cdtype), 0, Dp_e), 1, Lp)   # (Dp_e, Lp)
    w_dec_src = enc_weight if dec_weight is None else dec_weight.T            # (L, D)
    w_dec = _pad_to(_pad_to(w_dec_src.astype(cdtype), 0, Lp), 1, Dp_d)        # (Lp, Dp_d)
    lb = _pad_to(lat_bias_eff.reshape(1, n_latents), 1, Lp)                   # (1, Lp) f32
    pb = _pad_to(pre_bias.astype(jnp.float32).reshape(1, n_inputs), 1, Dp_d)  # (1, Dp_d) f32

    return dict(w_enc_t=w_enc_t, w_dec=w_dec, lat_bias_eff=lb, pre_bias=pb,
                n_inputs=n_inputs, n_latents=n_latents,
                tl=tl, tk_e=tk_e, tn_d=tn_d, cdtype=cdtype)


def autoencoder_apply(params, x, *, tm_pref=1024):
    """Forward pass with pre-prepared params. Returns (latents_pre_act, latents, recons)."""
    D = params["n_inputs"]
    L = params["n_latents"]
    assert x.shape[-1] == D
    batch_shape = x.shape[:-1]
    out_dtype = x.dtype
    cdtype = params["cdtype"]
    tl, tk_e, tn_d = params["tl"], params["tk_e"], params["tn_d"]
    Dp_e, Lp = params["w_enc_t"].shape
    _, Dp_d = params["w_dec"].shape

    x2 = x.reshape(-1, D)
    M = x2.shape[0]

    cb = jnp.dtype(cdtype).itemsize
    ob = jnp.dtype(out_dtype).itemsize
    emit_latc = jnp.dtype(cdtype) != jnp.dtype(out_dtype)
    direct_acc = jnp.dtype(out_dtype) == jnp.dtype(jnp.float32)
    sub = max(8, 32 // cb)                      # sublane packing of compute dtype

    # VMEM-budgeted tm (shared by encode+decode so the padded latents feed decode
    # directly, no re-pad of the M x L intermediate).
    cap = _vmem_capacity_bytes()
    budget = int(0.55 * cap)
    vmem_limit = int(0.90 * cap)

    enc_fixed = 2 * tk_e * tl * cb + 2 * tl * 4
    enc_row = (2 * tk_e * cb + 2 * 2 * tl * ob
               + (2 * tl * cb if emit_latc else 0)
               + (0 if direct_acc else tl * 4))
    dec_fixed = 2 * tl * tn_d * cb + 2 * tn_d * 4
    dec_row = 2 * tl * cb + 2 * tn_d * ob + (0 if direct_acc else tn_d * 4)

    tm = min(tm_pref,
             max(sub, (budget - enc_fixed) // enc_row),
             max(sub, (budget - dec_fixed) // dec_row),
             _round_up(M, sub))
    tm = (tm // 128) * 128 if tm >= 128 else max(sub, (tm // sub) * sub)
    tm = int(tm)
    Mp = _round_up(M, tm)

    x_p = _pad_to(_pad_to(x2.astype(cdtype), 0, Mp), 1, Dp_e)

    enc_outs = _encode_call(x_p, params["w_enc_t"], params["lat_bias_eff"],
                            tm, tk_e, tl, out_dtype, cdtype, emit_latc, vmem_limit)
    pre_p, lat_p = enc_outs[0], enc_outs[1]
    lat_feed = enc_outs[2] if emit_latc else lat_p      # compute-dtype latents

    rec_p = _decode_call(lat_feed, params["w_dec"], params["pre_bias"],
                         tm, tl, tn_d, out_dtype, vmem_limit)

    pre = pre_p if (Mp == M and Lp == L) else pre_p[:M, :L]
    lat = lat_p if (Mp == M and Lp == L) else lat_p[:M, :L]
    rec = rec_p if (Mp == M and Dp_d == D) else rec_p[:M, :D]

    return (pre.reshape(*batch_shape, L),
            lat.reshape(*batch_shape, L),
            rec.reshape(*batch_shape, D))


def autoencoder_forward(x, enc_weight, pre_bias, latent_bias, dec_weight=None,
                        *, compute_dtype=jnp.bfloat16, tm=1024):
    """Convenience wrapper: prepare params + apply. For repeated forwards, call
    prepare_autoencoder_params() once and autoencoder_apply() per batch."""
    params = prepare_autoencoder_params(enc_weight, pre_bias, latent_bias, dec_weight,
                                        compute_dtype=compute_dtype)
    return autoencoder_apply(params, x, tm_pref=tm)


def update_stats_last_nonzero(stats, latents):
    """stats_last_nonzero buffer update from Autoencoder.forward (tiny, plain jnp).

    stats := stats * all(latents == 0 over flattened batch) + 1
    """
    # TODO(synk): in-place .register_buffer mutation has no Pallas equivalent;
    # returned functionally instead.
    dead = jnp.all(latents.reshape(-1, latents.shape[-1]) == 0, axis=0)
    return stats * dead.astype(stats.dtype) + 1


# ----------------------------- demo / test ----------------------------------


if __name__ == "__main__":
    batch, seq = 4, 8
    n_inputs, n_latents = 64, 256

    key = jax.random.PRNGKey(0)
    kx, kw, kpb, klb = jax.random.split(key, 4)
    x = jax.random.normal(kx, (batch, seq, n_inputs), dtype=jnp.float32)
    enc_weight = (jax.random.normal(kw, (n_latents, n_inputs), dtype=jnp.float32)
                  / jnp.sqrt(n_inputs))
    pre_bias = 0.1 * jax.random.normal(kpb, (n_inputs,), dtype=jnp.float32)
    latent_bias = 0.1 * jax.random.normal(klb, (n_latents,), dtype=jnp.float32)

    # Pure-JAX reference (matches the PyTorch forward for tied=True, ReLU).
    pre_ref = (x - pre_bias) @ enc_weight.T + latent_bias
    lat_ref = jnp.maximum(pre_ref, 0.0)
    rec_ref = lat_ref @ enc_weight + pre_bias

    # --- f32 compute path (tight check), tied decoder (TiedTranspose) ---------
    pre, lat, rec = autoencoder_forward(x, enc_weight, pre_bias, latent_bias,
                                        compute_dtype=jnp.float32)
    jax.block_until_ready((pre, lat, rec))
    assert pre.shape == (batch, seq, n_latents)
    assert lat.shape == (batch, seq, n_latents)
    assert rec.shape == (batch, seq, n_inputs)
    assert jnp.allclose(pre, pre_ref, atol=2e-4, rtol=2e-4)
    assert jnp.allclose(lat, lat_ref, atol=2e-4, rtol=2e-4)
    assert jnp.allclose(rec, rec_ref, atol=2e-4, rtol=2e-4)

    stats = update_stats_last_nonzero(jnp.zeros((n_latents,), jnp.int32), lat)
    assert stats.shape == (n_latents,)

    # --- default bf16 operand path (f32 MXU accumulation), looser tolerance ---
    pre_b, lat_b, rec_b = autoencoder_forward(x, enc_weight, pre_bias, latent_bias)
    jax.block_until_ready((pre_b, lat_b, rec_b))
    assert jnp.allclose(pre_b, pre_ref, atol=1e-1, rtol=1e-1)
    assert jnp.allclose(rec_b, rec_ref, atol=1e-1, rtol=1e-1)

    # --- untied decoder path (nn.Linear decoder), f32 compute -----------------
    dec_weight = (jax.random.normal(jax.random.PRNGKey(1),
                                    (n_inputs, n_latents), dtype=jnp.float32)
                  / jnp.sqrt(n_latents))
    _, _, rec_u = autoencoder_forward(x, enc_weight, pre_bias, latent_bias, dec_weight,
                                      compute_dtype=jnp.float32)
    rec_u = jax.block_until_ready(rec_u)
    rec_u_ref = lat_ref @ dec_weight.T + pre_bias
    assert jnp.allclose(rec_u, rec_u_ref, atol=2e-4, rtol=2e-4)

    print("KERNEL_OK")
</pallas_src>

<mosaic_0001>
module attributes {stable_mosaic.version = 11 : i64} {
  func.func @_encode_kernel(%arg0: i32, %arg1: i32, %arg2: i32, %arg3: memref<32x128xf32, #tpu.memory_space<vmem>>, %arg4: memref<128x256xf32, #tpu.memory_space<vmem>>, %arg5: memref<1x256xf32, #tpu.memory_space<vmem>>, %arg6: memref<32x256xf32, #tpu.memory_space<vmem>>, %arg7: memref<32x256xf32, #tpu.memory_space<vmem>>) attributes {dimension_semantics = [#tpu.dimension_semantics<parallel>, #tpu.dimension_semantics<parallel>, #tpu.dimension_semantics<arbitrary>], iteration_bounds = array<i64: 1, 1, 1>, scalar_prefetch = 0 : i64, scratch_operands = 0 : i64, tpu.core_type = #tpu.core_type<tc>, window_params = [{transform_indices = @transform_0, window_bounds = array<i64: 32, 128>}, {transform_indices = @transform_1, window_bounds = array<i64: 128, 256>}, {transform_indices = @transform_2, window_bounds = array<i64: 1, 256>}, {transform_indices = @transform_3, window_bounds = array<i64: 32, 256>}, {transform_indices = @transform_4, window_bounds = array<i64: 32, 256>}]} {
    %c0_i32 = arith.constant 0 : i32
    %0 = arith.cmpi eq, %arg2, %c0_i32 : i32
    %1 = arith.extui %0 : i1 to i32
    %c0_i32_0 = arith.constant 0 : i32
    %2 = arith.cmpi ne, %1, %c0_i32_0 : i32
    scf.if %2 {
      %cst_10 = arith.constant 0.000000e+00 : f32
      %12 = vector.broadcast %cst_10 : f32 to vector<32x256xf32>
      %c0_11 = arith.constant 0 : index
      %c0_12 = arith.constant 0 : index
      %13 = vector.load %arg6[%c0_11, %c0_12] : memref<32x256xf32, #tpu.memory_space<vmem>>, vector<32x256xf32>
      tpu.vector_store %arg6[%c0_11, %c0_12], %12 {strides = array<i32>} : memref<32x256xf32, #tpu.memory_space<vmem>>, vector<32x256xf32>,
    } else {
    }
    %c0 = arith.constant 0 : index
    %c0_1 = arith.constant 0 : index
    %3 = vector.load %arg6[%c0, %c0_1] : memref<32x256xf32, #tpu.memory_space<vmem>>, vector<32x256xf32>
    %c0_2 = arith.constant 0 : index
    %c0_3 = arith.constant 0 : index
    %4 = vector.load %arg3[%c0_2, %c0_3] : memref<32x128xf32, #tpu.memory_space<vmem>>, vector<32x128xf32>
    %c0_4 = arith.constant 0 : index
    %c0_5 = arith.constant 0 : index
    %5 = vector.load %arg4[%c0_4, %c0_5] : memref<128x256xf32, #tpu.memory_space<vmem>>, vector<128x256xf32>
    %cst = arith.constant dense<0.000000e+00> : vector<32x256xf32>
    %6 = tpu.matmul %4, %5, %cst {dimension_numbers = #tpu.dot_dimension_numbers<[1], [0], [0], [1], [0, 0, 1, 1], [], []>} : vector<32x128xf32>, vector<128x256xf32>, vector<32x256xf32> -> vector<32x256xf32>
    %7 = arith.addf %3, %6 : vector<32x256xf32>
    %c0_6 = arith.constant 0 : index
    %c0_7 = arith.constant 0 : index
    %8 = vector.load %arg6[%c0_6, %c0_7] : memref<32x256xf32, #tpu.memory_space<vmem>>, vector<32x256xf32>
    tpu.vector_store %arg6[%c0_6, %c0_7], %7 {strides = array<i32>} : memref<32x256xf32, #tpu.memory_space<vmem>>, vector<32x256xf32>,
    %c0_i32_8 = arith.constant 0 : i32
    %9 = arith.cmpi eq, %arg2, %c0_i32_8 : i32
    %10 = arith.extui %9 : i1 to i32
    %c0_i32_9 = arith.constant 0 : i32
    %11 = arith.cmpi ne, %10, %c0_i32_9 : i32
    scf.if %11 {
      %c0_10 = arith.constant 0 : index
      %c0_11 = arith.constant 0 : index
      %12 = vector.load %arg6[%c0_10, %c0_11] : memref<32x256xf32, #tpu.memory_space<vmem>>, vector<32x256xf32>
      %c0_12 = arith.constant 0 : index
      %c0_13 = arith.constant 0 : index
      %13 = vector.load %arg5[%c0_12, %c0_13] : memref<1x256xf32, #tpu.memory_space<vmem>>, vector<1x256xf32>
      %14 = vector.broadcast %13 : vector<1x256xf32> to vector<32x256xf32>
      %15 = arith.addf %12, %14 : vector<32x256xf32>
      %cst_14 = arith.constant 0.000000e+00 : f32
      %16 = vector.broadcast %cst_14 : f32 to vector<32x256xf32>
      %17 = arith.maximumf %15, %16 : vector<32x256xf32>
      %c0_15 = arith.constant 0 : index
      %c0_16 = arith.constant 0 : index
      %18 = vector.load %arg6[%c0_15, %c0_16] : memref<32x256xf32, #tpu.memory_space<vmem>>, vector<32x256xf32>
      tpu.vector_store %arg6[%c0_15, %c0_16], %15 {strides = array<i32>} : memref<32x256xf32, #tpu.memory_space<vmem>>, vector<32x256xf32>,
      %c0_17 = arith.constant 0 : index
      %c0_18 = arith.constant 0 : index
      %19 = vector.load %arg7[%c0_17, %c0_18] : memref<32x256xf32, #tpu.memory_space<vmem>>, vector<32x256xf32>
      tpu.vector_store %arg7[%c0_17, %c0_18], %17 {strides = array<i32>} : memref<32x256xf32, #tpu.memory_space<vmem>>, vector<32x256xf32>,
    } else {
    }
    return
  }
  func.func @transform_0(%arg0: i32, %arg1: i32, %arg2: i32) -> (i32, i32) {
    %c0_i32 = arith.constant 0 : i32
    return %arg0, %arg2 : i32, i32
  }
  func.func @transform_1(%arg0: i32, %arg1: i32, %arg2: i32) -> (i32, i32) {
    %c0_i32 = arith.constant 0 : i32
    return %arg2, %arg1 : i32, i32
  }
  func.func @transform_2(%arg0: i32, %arg1: i32, %arg2: i32) -> (i32, i32) {
    %c0_i32 = arith.constant 0 : i32
    %c0_i32_0 = arith.constant 0 : i32
    return %c0_i32, %arg1 : i32, i32
  }
  func.func @transform_3(%arg0: i32, %arg1: i32, %arg2: i32) -> (i32, i32) {
    %c0_i32 = arith.constant 0 : i32
    return %arg0, %arg1 : i32, i32
  }
  func.func @transform_4(%arg0: i32, %arg1: i32, %arg2: i32) -> (i32, i32) {
    %c0_i32 = arith.constant 0 : i32
    return %arg0, %arg1 : i32, i32
  }
}

</mosaic_0001>

<bundles_post_ra>
// kernel: tpu_custom_call.1
= control target key start
LH: loop header
LB: loop body
LE: loop exit
PB: predicated region body
PF: predicated region fallthrough
CT: control target
= control target key end

     0   :  { %10 = vsyncpa [#allocation3], 0  ;;  %s508_s0 = inlined_call_operand.hbm [shape: f32[32,128], index: 0, kind: input, shape index: {}]   ;;  %s509_s1 = inlined_call_operand.hbm [shape: f32[128,256], index: 1, kind: input, shape index: {}]   ;;  %s510_s2 = inlined_call_operand.hbm [shape: f32[1,256], index: 2, kind: input, shape index: {}]   ;;  %s511_s3 = inlined_call_operand.hbm [shape: f32[32,256], index: 3, kind: output, shape index: {0}]   ;;  %s512_s4 = inlined_call_operand.hbm [shape: f32[32,256], index: 4, kind: output, shape index: {1}]  }
   0x1   :  { %11 = vsyncpa [#allocation6], 0 }
   0x2   :  { %12 = vsyncpa [#allocation4], 0  ;;  %s31_s17 = sshll.u32 %s509_s1, 4  ;;  %s32_s17 = int_to_ptr.hbm [resolvable:$true] %s31_s17 }
   0x3   :  { %13 = vsyncpa [#allocation10], 0  ;;  %s450_s18 = smov [#allocation5]   ;;  %s18_s22 = sshll.u32 %s508_s0, 4  ;;  %s19_s22 = int_to_ptr.hbm [resolvable:$true] %s18_s22 }
   0x4   :  { %s33_s19 = sshll.u32 %s450_s18, 4  ;;  %s451_s23 = smov 256   ;;  %s34_s19 = int_to_ptr.vmem [resolvable:$true] %s33_s19 }
   0x5   :  { %s452_s24 = smov 16   ;;  %s453_s25 = smov [#allocation2]  }
   0x6   :  { %39 = dma.hbm_to_vmem [thread:$0]  %s32_s17, 4096, %s34_s19, [#allocation6], %s451_s23, %s451_s23, %s452_s24  }
   0x7   :  { %s20_s26 = sshll.u32 %s453_s25, 4  ;;  %s454_s1 = smov 128   ;;  %s21_s26 = int_to_ptr.vmem [resolvable:$true] %s20_s26 }
   0x8   :  { %s455_s27 = smov 8   ;;  %s45_s30 = sshll.u32 %s510_s2, 4  ;;  %s46_s30 = int_to_ptr.hbm [resolvable:$true] %s45_s30 }
   0x9   :  { %26 = dma.hbm_to_vmem [thread:$0]  %s19_s22, 512, %s21_s26, [#allocation3], %s454_s1, %s454_s1, %s455_s27  }
   0xa   :  { %s456_s5 = smov [#allocation7]  }
   0xb   :  { %s47_s0 = sshll.u32 %s456_s5, 4  ;;  %s48_s0 = int_to_ptr.vmem [resolvable:$true] %s47_s0 }
   0xc   :  { %50 = dma.hbm_to_vmem [thread:$0]  %s46_s30, 32, %s48_s0, [#allocation6]  }
   0xd   :  { %442 = dma.done.wait [#allocation3], 512  }
   0xe   :  { %443 = vsyncadd [#allocation3], 4294966784 }
   0xf   :  { %444 = dma.done.wait [#allocation6], 4128  }
  0x10   :  { %445 = vsyncadd [#allocation6], 4294963168  ;;  %v117_v0 = vld [vmem:[#allocation5 + $0xf0] sm:$0xff]  ;;  %v118_v1 = vld [vmem:[#allocation5 + $0xf8] sm:$0xff]  ;;  %s457_s2 = smov [#allocation8]   ;;  %s248_s9 = sshll.u32 %s511_s3, 4  ;;  %s249_s9 = int_to_ptr.hbm [resolvable:$true] %s248_s9 }
  0x11   :  { %v115_v2 = vld [vmem:[#allocation5 + $0xe0] sm:$0xff]  ;;  %280 = vmatpush.msra.mxu2 %v117_v0  ;;  %296 = vmatpush.msra.mxu3 %v118_v1  ;;  %v116_v3 = vld [vmem:[#allocation5 + $0xe8] sm:$0xff]  ;;  %v113_v4 = vld [vmem:[#allocation5 + $0xd0] sm:$0xff]  ;;  %s246_s6 = sshll.u32 %s457_s2, 4  ;;  %s458_s10 = smov [#allocation9]   ;;  %s247_s6 = int_to_ptr.vmem [resolvable:$true] %s246_s6 }
  0x12   :  { %v114_v5 = vld [vmem:[#allocation5 + $0xd8] sm:$0xff]  ;;  %119 = vmatpush.msra.mxu0 %v117_v0  ;;  %148 = vmatpush.msra.mxu1 %v118_v1  ;;  %v111_v6 = vld [vmem:[#allocation5 + $0xc0] sm:$0xff]  ;;  %v112_v7 = vld [vmem:[#allocation5 + $0xc8] sm:$0xff]  ;;  %s259_s11 = sshll.u32 %s458_s10, 4  ;;  %s261_s14 = sshll.u32 %s512_s4, 4  ;;  %s260_s11 = int_to_ptr.vmem [resolvable:$true] %s259_s11  ;;  %s262_s14 = int_to_ptr.hbm [resolvable:$true] %s261_s14 }
  0x13   :  { %281 = vmatpush.msra.mxu2 %v115_v2  ;;  %297 = vmatpush.msra.mxu3 %v116_v3  ;;  %v109_v8 = vld [vmem:[#allocation5 + $0xb0] sm:$0xff]  ;;  %v110_v9 = vld [vmem:[#allocation5 + $0xb8] sm:$0xff]  ;;  %v107_v10 = vld [vmem:[#allocation5 + $0xa0] sm:$0xff] }
  0x14   :  { %120 = vmatpush.msra.mxu0 %v115_v2  ;;  %149 = vmatpush.msra.mxu1 %v116_v3  ;;  %v108_v11 = vld [vmem:[#allocation5 + $0xa8] sm:$0xff]  ;;  %v105_v12 = vld [vmem:[#allocation5 + $0x90] sm:$0xff]  ;;  %v106_v13 = vld [vmem:[#allocation5 + $0x98] sm:$0xff] }
  0x15   :  { %282 = vmatpush.msra.mxu2 %v113_v4  ;;  %298 = vmatpush.msra.mxu3 %v114_v5  ;;  %v103_v14 = vld [vmem:[#allocation5 + $0x80] sm:$0xff]  ;;  %v104_v15 = vld [vmem:[#allocation5 + $0x88] sm:$0xff]  ;;  %v101_v16 = vld [vmem:[#allocation5 + $0x70] sm:$0xff] }
  0x16   :  { %121 = vmatpush.msra.mxu0 %v113_v4  ;;  %150 = vmatpush.msra.mxu1 %v114_v5  ;;  %v102_v17 = vld [vmem:[#allocation5 + $0x78] sm:$0xff]  ;;  %v99_v18 = vld [vmem:[#allocation5 + $0x60] sm:$0xff]  ;;  %v100_v19 = vld [vmem:[#allocation5 + $0x68] sm:$0xff] }
  0x17   :  { %283 = vmatpush.msra.mxu2 %v111_v6  ;;  %299 = vmatpush.msra.mxu3 %v112_v7  ;;  %v97_v20 = vld [vmem:[#allocation5 + $0x50] sm:$0xff]  ;;  %v98_v21 = vld [vmem:[#allocation5 + $0x58] sm:$0xff]  ;;  %v95_v22 = vld [vmem:[#allocation5 + $0x40] sm:$0xff] }
  0x18   :  { %122 = vmatpush.msra.mxu0 %v111_v6  ;;  %151 = vmatpush.msra.mxu1 %v112_v7  ;;  %v96_v23 = vld [vmem:[#allocation5 + $0x48] sm:$0xff]  ;;  %v93_v24 = vld [vmem:[#allocation5 + $0x30] sm:$0xff]  ;;  %v94_v25 = vld [vmem:[#allocation5 + $0x38] sm:$0xff] }
  0x19   :  { %284 = vmatpush.msra.mxu2 %v109_v8  ;;  %300 = vmatpush.msra.mxu3 %v110_v9  ;;  %v91_v26 = vld [vmem:[#allocation5 + $0x20] sm:$0xff]  ;;  %v92_v27 = vld [vmem:[#allocation5 + $0x28] sm:$0xff]  ;;  %v89_v28 = vld [vmem:[#allocation5 + $0x10] sm:$0xff] }
  0x1a   :  { %123 = vmatpush.msra.mxu0 %v109_v8  ;;  %152 = vmatpush.msra.mxu1 %v110_v9  ;;  %v90_v29 = vld [vmem:[#allocation5 + $0x18] sm:$0xff]  ;;  %v87_v30 = vld [vmem:[#allocation5] sm:$0xff]  ;;  %v88_v31 = vld [vmem:[#allocation5 + $0x8] sm:$0xff] }
  0x1b   :  { %285 = vmatpush.msra.mxu2 %v107_v10  ;;  %301 = vmatpush.msra.mxu3 %v108_v11  ;;  %v85_v32 = vld [vmem:[#allocation2 + $0x10] sm:$0xff]  ;;  %v83_v33 = vld [vmem:[#allocation2] sm:$0xff]  ;;  %v86_v34 = vld [vmem:[#allocation2 + $0x18] sm:$0xff] }
  0x1c   :  { %124 = vmatpush.msra.mxu0 %v107_v10  ;;  %153 = vmatpush.msra.mxu1 %v108_v11  ;;  %v84_v35 = vld [vmem:[#allocation2 + $0x8] sm:$0xff]  ;;  %v204_v36 = vld [vmem:[#allocation7] sm:$0x3] }
  0x1d   :  { %286 = vmatpush.msra.mxu2 %v105_v12  ;;  %302 = vmatpush.msra.mxu3 %v106_v13  ;;  %v206_v37 = vperm.slane %v204_v36, 0  ;;  %v207_v38 = vperm.slane %v204_v36, 1 }
  0x1e   :  { %125 = vmatpush.msra.mxu0 %v105_v12  ;;  %154 = vmatpush.msra.mxu1 %v106_v13 }
  0x1f   :  { %287 = vmatpush.msra.mxu2 %v103_v14  ;;  %303 = vmatpush.msra.mxu3 %v104_v15 }
  0x20   :  { %126 = vmatpush.msra.mxu0 %v103_v14  ;;  %155 = vmatpush.msra.mxu1 %v104_v15 }
  0x21   :  { %288 = vmatpush.msra.mxu2 %v101_v16  ;;  %304 = vmatpush.msra.mxu3 %v102_v17 }
  0x22   :  { %127 = vmatpush.msra.mxu0 %v101_v16  ;;  %156 = vmatpush.msra.mxu1 %v102_v17 }
  0x23   :  { %289 = vmatpush.msra.mxu2 %v99_v18  ;;  %305 = vmatpush.msra.mxu3 %v100_v19 }
  0x24   :  { %128 = vmatpush.msra.mxu0 %v99_v18  ;;  %157 = vmatpush.msra.mxu1 %v100_v19 }
  0x25   :  { %290 = vmatpush.msra.mxu2 %v97_v20  ;;  %306 = vmatpush.msra.mxu3 %v98_v21 }
  0x26   :  { %129 = vmatpush.msra.mxu0 %v97_v20  ;;  %158 = vmatpush.msra.mxu1 %v98_v21 }
  0x27   :  { %291 = vmatpush.msra.mxu2 %v95_v22  ;;  %307 = vmatpush.msra.mxu3 %v96_v23 }
  0x28   :  { %130 = vmatpush.msra.mxu0 %v95_v22  ;;  %159 = vmatpush.msra.mxu1 %v96_v23 }
  0x29   :  { %292 = vmatpush.msra.mxu2 %v93_v24  ;;  %308 = vmatpush.msra.mxu3 %v94_v25 }
  0x2a   :  { %131 = vmatpush.msra.mxu0 %v93_v24  ;;  %160 = vmatpush.msra.mxu1 %v94_v25 }
  0x2b   :  { %293 = vmatpush.msra.mxu2 %v91_v26  ;;  %309 = vmatpush.msra.mxu3 %v92_v27 }
  0x2c   :  { %132 = vmatpush.msra.mxu0 %v91_v26  ;;  %161 = vmatpush.msra.mxu1 %v92_v27 }
  0x2d   :  { %294 = vmatpush.msra.mxu2 %v89_v28  ;;  %310 = vmatpush.msra.mxu3 %v90_v29 }
  0x2e   :  { %133 = vmatpush.msra.mxu0 %v89_v28  ;;  %162 = vmatpush.msra.mxu1 %v90_v29 }
  0x2f   :  { %295 = vmatpush.msra.mxu2 %v87_v30  ;;  %311 = vmatpush.msra.mxu3 %v88_v31 }
  0x30   :  { %141 = vmatmul.f32.vlgmr.msra.gmra.mxu2 %v85_v32  ;;  %170 = vmatmul.f32.vlgmr.msra.gmra.mxu3 %v85_v32 }
  0x31   :  { %134 = vmatpush.msra.mxu0 %v87_v30  ;;  %163 = vmatpush.msra.mxu1 %v88_v31 }
  0x32   :  { %135 = vmatmul.f32.vlgmr.msra.gmra.mxu0 %v83_v33  ;;  %164 = vmatmul.f32.vlgmr.msra.gmra.mxu1 %v83_v33 }
  0x38   :  { %144 = vmatmul.f32.gmra.mxu2 %v86_v34  ;;  %173 = vmatmul.f32.gmra.mxu3 %v86_v34 }
  0x3a   :  { %138 = vmatmul.f32.gmra.mxu0 %v84_v35  ;;  %167 = vmatmul.f32.gmra.mxu1 %v84_v35 }
  0xaf   :  { %v136_v39 = vpop.f32.mrf.mxu0  ;;  %v165_v40 = vpop.f32.mrf.mxu1 }
  0xb0   :  { %v210_v41 = vadd.f32 %v206_v37, %v136_v39  ;;  %v211_v42 = vadd.f32 %v207_v38, %v165_v40 }
  0xb2   :  { %v218_v45 = vmax.f32 %v210_v41, 0.0  ;;  %226 = vst [vmem:[#allocation8] sm:$0xff] %v210_v41  ;;  %v219_v46 = vmax.f32 %v211_v42, 0.0 }
  0xb3   :  { %v142_v43 = vpop.f32.mrf.mxu2  ;;  %v171_v44 = vpop.f32.mrf.mxu3  ;;  %227 = vst [vmem:[#allocation8 + $0x8] sm:$0xff] %v211_v42 }
  0xb4   :  { %234 = vst [vmem:[#allocation9] sm:$0xff] %v218_v45  ;;  %v214_v47 = vadd.f32 %v206_v37, %v142_v43  ;;  %v215_v48 = vadd.f32 %v207_v38, %v171_v44 }
  0xb5   :  { %235 = vst [vmem:[#allocation9 + $0x8] sm:$0xff] %v219_v46 }
  0xb6   :  { %v222_v51 = vmax.f32 %v214_v47, 0.0  ;;  %230 = vst [vmem:[#allocation8 + $0x20] sm:$0xff] %v214_v47  ;;  %v223_v52 = vmax.f32 %v215_v48, 0.0 }
  0xb7   :  { %v139_v49 = vpop.f32.mrf.mxu0  ;;  %v168_v50 = vpop.f32.mrf.mxu1  ;;  %231 = vst [vmem:[#allocation8 + $0x28] sm:$0xff] %v215_v48 }
  0xb8   :  { %238 = vst [vmem:[#allocation9 + $0x20] sm:$0xff] %v222_v51  ;;  %v212_v53 = vadd.f32 %v206_v37, %v139_v49  ;;  %v213_v54 = vadd.f32 %v207_v38, %v168_v50 }
  0xb9   :  { %239 = vst [vmem:[#allocation9 + $0x28] sm:$0xff] %v223_v52 }
  0xba   :  { %v220_v57 = vmax.f32 %v212_v53, 0.0  ;;  %228 = vst [vmem:[#allocation8 + $0x10] sm:$0xff] %v212_v53  ;;  %v221_v58 = vmax.f32 %v213_v54, 0.0 }
  0xbb   :  { %v145_v55 = vpop.f32.mrf.mxu2  ;;  %v174_v56 = vpop.f32.mrf.mxu3  ;;  %229 = vst [vmem:[#allocation8 + $0x18] sm:$0xff] %v213_v54 }
  0xbc   :  { %236 = vst [vmem:[#allocation9 + $0x10] sm:$0xff] %v220_v57  ;;  %v216_v59 = vadd.f32 %v206_v37, %v145_v55  ;;  %v217_v60 = vadd.f32 %v207_v38, %v174_v56 }
  0xbd   :  { %237 = vst [vmem:[#allocation9 + $0x18] sm:$0xff] %v221_v58 }
  0xbe   :  { %v224_v61 = vmax.f32 %v216_v59, 0.0  ;;  %232 = vst [vmem:[#allocation8 + $0x30] sm:$0xff] %v216_v59  ;;  %v225_v62 = vmax.f32 %v217_v60, 0.0 }
  0xbf   :  { %233 = vst [vmem:[#allocation8 + $0x38] sm:$0xff] %v217_v60 }
  0xc0   :  { %240 = vst [vmem:[#allocation9 + $0x30] sm:$0xff] %v224_v61  ;;  %254 = dma.vmem_to_hbm [thread:$0]  %s247_s6, 1024, %s249_s9, [#allocation4], %s451_s23, %s451_s23, %s452_s24  }
  0xc1   :  { %241 = vst [vmem:[#allocation9 + $0x38] sm:$0xff] %v225_v62 }
  0xc2   :  { %267 = dma.vmem_to_hbm [thread:$0]  %s260_s11, 1024, %s262_s14, [#allocation10], %s451_s23, %s451_s23, %s452_s24  }
  0xc3   :  { %446 = dma.done.wait [#allocation4], 1024  }
  0xc4   :  { %447 = vsyncadd [#allocation4], 4294966272 }
  0xc5   :  { %448 = dma.done.wait [#allocation10], 1024  }
  0xc6   :  { %449 = vsyncadd [#allocation10], 4294966272 }
  0xc7   :  { %276 = vsyncpa [#allocation3], 1 }
  0xc8   :  { %277 = vsyncpa [#allocation6], 1 }
  0xc9   :  { %278 = vsyncpa [#allocation4], 1 }
  0xca   :  { %279 = vsyncpa [#allocation10], 1 }

</bundles_post_ra>
